<compile_context>
chip_gen: v7x
topology: tpu7x:2x2x1
jax: 0.10.0
libtpu: 0.0.40
codegen_flags: <defaults>
</compile_context>

<pallas_src>
import math

import jax
import jax.numpy as jnp
from jax.experimental import pallas as pl
from jax.experimental.pallas import tpu as pltpu


_SMALL_INPUT_BYTES = 2 * 1024 * 1024  # below this a fused XLA op wins outright

# Generation-keyed x-tile byte target and scoped-VMEM limit (bytes).
_TILE_TARGET_BYTES = {"v5e": 3 << 20, "v6e": 6 << 20, "v7x": 10 << 20,
                      "default": 6 << 20}
_VMEM_LIMIT_BYTES = {"v5e": 24 << 20, "v6e": 56 << 20, "v7x": 44 << 20,
                     "default": 48 << 20}


def _cmvn_kernel_norm_var(x_ref, mean_ref, istd_ref, o_ref):
    # x_ref: (tm, L); mean_ref / istd_ref: (1, L) broadcast over rows.
    x = x_ref[...].astype(jnp.float32)
    o_ref[...] = ((x - mean_ref[...]) * istd_ref[...]).astype(o_ref.dtype)


def _cmvn_kernel_no_var(x_ref, mean_ref, o_ref):
    x = x_ref[...].astype(jnp.float32)
    o_ref[...] = (x - mean_ref[...]).astype(o_ref.dtype)


def _tpu_generation():
    try:
        kind = jax.devices()[0].device_kind.lower().replace(" ", "")
    except Exception:
        return "default"
    if "v7" in kind or "tpu7" in kind:
        return "v7x"
    if "v6" in kind:
        return "v6e"
    if "v5e" in kind or "v5lite" in kind:
        return "v5e"
    return "default"


def _sublane_multiple(dtype):
    itemsize = jnp.dtype(dtype).itemsize
    return max(8, 32 // max(1, itemsize))  # 8 for f32, 16 for bf16, 32 for int8


def _round_up(v, m):
    return ((v + m - 1) // m) * m


def _choose_row_tile(lanes, dtype, gen):
    itemsize = jnp.dtype(dtype).itemsize
    target = _TILE_TARGET_BYTES.get(gen, _TILE_TARGET_BYTES["default"])
    mult = _sublane_multiple(dtype)
    tm = target // max(1, lanes * itemsize)
    return max(mult, (tm // mult) * mult)


def global_cmvn(x, mean, istd, norm_var=True, *, row_tile=None,
                force_pallas=False):
    """Pallas implementation of GlobalCMVN.forward.

    Args:
      x:    (batch, max_len, feat_dim) float array
      mean: (feat_dim,) mean stats
      istd: (feat_dim,) inverse std (1.0 / std)
      norm_var: whether to multiply by istd after mean subtraction
      row_tile: optional row-tile override (rounded to the sublane multiple)
      force_pallas: skip the small-input XLA fast path (testing)
    Returns:
      normalized features, same shape/dtype as x
    """
    B, T, D = x.shape
    mean32 = mean.astype(jnp.float32).reshape(D)
    istd32 = istd.astype(jnp.float32).reshape(D)

    # Small inputs: pallas_call dispatch + pipeline warm-up dwarfs the data.
    nbytes = x.size * jnp.dtype(x.dtype).itemsize
    if nbytes < _SMALL_INPUT_BYTES and not force_pallas:
        y = x.astype(jnp.float32) - mean32[None, None, :]
        if norm_var:
            y = y * istd32[None, None, :]
        return y.astype(x.dtype)

    gen = _tpu_generation()
    rows = B * T

    # ---- lane-dense packing of the feature dimension ------------------------
    if D % 128 == 0:
        lanes, g = D, 1                           # already lane-dense
    else:
        lanes = (D * 128) // math.gcd(D, 128)     # lcm(D, 128)
        g = lanes // D                            # rows folded per packed row
        if rows % g != 0:
            lanes, g = D, 1                       # masked-lane fallback
    rows_p = rows // g
    x2d = x.reshape(rows_p, lanes)
    mean_l = mean32 if g == 1 else jnp.tile(mean32, g)
    istd_l = istd32 if g == 1 else jnp.tile(istd32, g)
    mean2d = mean_l.reshape(1, lanes)
    istd2d = istd_l.reshape(1, lanes)

    # ---- row tile (byte-sized, generation-keyed) ----------------------------
    mult = _sublane_multiple(x.dtype)
    if row_tile is not None:
        tm = max(mult, _round_up(int(row_tile), mult))
    else:
        tm = _choose_row_tile(lanes, x.dtype, gen)

    if tm >= rows_p:
        if gen == "v7x" and rows_p >= 2 * mult:
            # Keep both v7x TensorCores busy and preserve DMA/compute overlap:
            # split into (at least) 2 grid steps instead of one full-extent block.
            tm = _round_up(pl.cdiv(rows_p, 2), mult)
            if tm >= rows_p:
                tm = rows_p
        else:
            tm = rows_p  # single full-extent block

    grid = (pl.cdiv(rows_p, tm),)

    itemsize = jnp.dtype(x.dtype).itemsize
    tile_bytes = min(tm, rows_p) * lanes * itemsize
    # Double-buffered input + output tiles, plus stats blocks and slack.
    vmem_limit = int(max(_VMEM_LIMIT_BYTES.get(gen, _VMEM_LIMIT_BYTES["default"]),
                         4 * tile_bytes + (6 << 20)))

    x_spec = pl.BlockSpec((tm, lanes), lambda i: (i, 0))
    stat_spec = pl.BlockSpec((1, lanes), lambda i: (0, 0))
    out_spec = pl.BlockSpec((tm, lanes), lambda i: (i, 0))

    if norm_var:
        kernel = _cmvn_kernel_norm_var
        in_specs = [x_spec, stat_spec, stat_spec]
        args = (x2d, mean2d, istd2d)
    else:
        # Don't allocate / DMA the unused istd operand.
        kernel = _cmvn_kernel_no_var
        in_specs = [x_spec, stat_spec]
        args = (x2d, mean2d)

    out2d = pl.pallas_call(
        kernel,
        out_shape=jax.ShapeDtypeStruct((rows_p, lanes), x.dtype),
        grid=grid,
        in_specs=in_specs,
        out_specs=out_spec,
        compiler_params=pltpu.CompilerParams(
            dimension_semantics=("parallel",),
            vmem_limit_bytes=vmem_limit,
        ),
    )(*args)

    return out2d.reshape(B, T, D)


if __name__ == "__main__":
    root = jax.random.PRNGKey(0)

    def run_case(case_id, B, T, D, norm_var, force_pallas=False, row_tile=None):
        kx, km, ks = jax.random.split(jax.random.fold_in(root, case_id), 3)
        x = jax.random.normal(kx, (B, T, D), dtype=jnp.float32)
        mean = jax.random.normal(km, (D,), dtype=jnp.float32)
        istd = 1.0 / (1.0 + jax.random.uniform(ks, (D,), dtype=jnp.float32))

        out = global_cmvn(x, mean, istd, norm_var=norm_var,
                          row_tile=row_tile, force_pallas=force_pallas)
        out = jax.block_until_ready(out)

        ref = x.astype(jnp.float32) - mean[None, None, :]
        if norm_var:
            ref = ref * istd[None, None, :]
        ref = ref.astype(x.dtype)
        assert out.shape == x.shape and out.dtype == x.dtype
        assert jnp.allclose(out, ref, atol=1e-5, rtol=1e-5), f"case {case_id} mismatch"

    # 1) tiny module-style shape: routed to the plain-XLA fast path.
    run_case(1, B=2, T=8, D=32, norm_var=True)
    # 2) lane-packed Pallas path: D=64 folds 2 rows into one 128-lane row.
    run_case(2, B=4, T=512, D=64, norm_var=True, force_pallas=True)
    # 3) speech-style D=80: 8 rows fold into 640 lane-dense lanes; norm_var=False.
    run_case(3, B=3, T=200, D=80, norm_var=False, force_pallas=True)
    # 4) non-packable row count (rows % g != 0): masked-lane fallback path.
    run_case(4, B=1, T=33, D=80, norm_var=True, force_pallas=True)

    print("KERNEL_OK")
</pallas_src>

<mosaic_0001>
module attributes {stable_mosaic.version = 11 : i64} {
  func.func @_cmvn_kernel_norm_var(%arg0: i32, %arg1: memref<1024x128xf32, #tpu.memory_space<vmem>>, %arg2: memref<1x128xf32, #tpu.memory_space<vmem>>, %arg3: memref<1x128xf32, #tpu.memory_space<vmem>>, %arg4: memref<1024x128xf32, #tpu.memory_space<vmem>>) attributes {dimension_semantics = [#tpu.dimension_semantics<parallel>], iteration_bounds = array<i64: 1>, scalar_prefetch = 0 : i64, scratch_operands = 0 : i64, tpu.core_type = #tpu.core_type<tc>, window_params = [{transform_indices = @transform_0, window_bounds = array<i64: 1024, 128>}, {pipeline_mode = #tpu.pipeline_mode<synchronous>, transform_indices = @transform_1, window_bounds = array<i64: 1, 128>}, {pipeline_mode = #tpu.pipeline_mode<synchronous>, transform_indices = @transform_2, window_bounds = array<i64: 1, 128>}, {transform_indices = @transform_3, window_bounds = array<i64: 1024, 128>}]} {
    %c0 = arith.constant 0 : index
    %c0_0 = arith.constant 0 : index
    %0 = vector.load %arg1[%c0, %c0_0] : memref<1024x128xf32, #tpu.memory_space<vmem>>, vector<1024x128xf32>
    %c0_1 = arith.constant 0 : index
    %c0_2 = arith.constant 0 : index
    %1 = vector.load %arg2[%c0_1, %c0_2] : memref<1x128xf32, #tpu.memory_space<vmem>>, vector<1x128xf32>
    %2 = vector.broadcast %1 : vector<1x128xf32> to vector<1024x128xf32>
    %3 = arith.subf %0, %2 : vector<1024x128xf32>
    %c0_3 = arith.constant 0 : index
    %c0_4 = arith.constant 0 : index
    %4 = vector.load %arg3[%c0_3, %c0_4] : memref<1x128xf32, #tpu.memory_space<vmem>>, vector<1x128xf32>
    %5 = vector.broadcast %4 : vector<1x128xf32> to vector<1024x128xf32>
    %6 = arith.mulf %3, %5 : vector<1024x128xf32>
    %c0_5 = arith.constant 0 : index
    %c0_6 = arith.constant 0 : index
    %7 = vector.load %arg4[%c0_5, %c0_6] : memref<1024x128xf32, #tpu.memory_space<vmem>>, vector<1024x128xf32>
    tpu.vector_store %arg4[%c0_5, %c0_6], %6 {strides = array<i32>} : memref<1024x128xf32, #tpu.memory_space<vmem>>, vector<1024x128xf32>,
    return
  }
  func.func @transform_0(%arg0: i32) -> (i32, i32) {
    %c0_i32 = arith.constant 0 : i32
    %c0_i32_0 = arith.constant 0 : i32
    return %arg0, %c0_i32 : i32, i32
  }
  func.func @transform_1(%arg0: i32) -> (i32, i32) {
    %c0_i32 = arith.constant 0 : i32
    %c0_i32_0 = arith.constant 0 : i32
    %c0_i32_1 = arith.constant 0 : i32
    return %c0_i32, %c0_i32_0 : i32, i32
  }
  func.func @transform_2(%arg0: i32) -> (i32, i32) {
    %c0_i32 = arith.constant 0 : i32
    %c0_i32_0 = arith.constant 0 : i32
    %c0_i32_1 = arith.constant 0 : i32
    return %c0_i32, %c0_i32_0 : i32, i32
  }
  func.func @transform_3(%arg0: i32) -> (i32, i32) {
    %c0_i32 = arith.constant 0 : i32
    %c0_i32_0 = arith.constant 0 : i32
    return %arg0, %c0_i32 : i32, i32
  }
}

</mosaic_0001>

<bundles_post_ra>
// kernel: tpu_custom_call.1
= control target key start
LH: loop header
LB: loop body
LE: loop exit
PB: predicated region body
PF: predicated region fallthrough
CT: control target
= control target key end

     0   :  { %8 = vsyncpa [#allocation3], 0  ;;  %s946_s0 = inlined_call_operand.hbm [shape: f32[1024,128], index: 0, kind: input, shape index: {}]   ;;  %s947_s1 = inlined_call_operand.vmem [shape: f32[1,128], index: 1, kind: input, shape index: {}]   ;;  %s948_s2 = inlined_call_operand.vmem [shape: f32[1,128], index: 2, kind: input, shape index: {}]   ;;  %s949_s3 = inlined_call_operand.hbm [shape: f32[1024,128], index: 3, kind: output, shape index: {}]  }
   0x1   :  { %9 = vsyncpa [#allocation4], 0  ;;  %s626_s12 = smov [#allocation2]   ;;  %s578_s16 = scalar_lea.hbm %s946_s0, 16384 }
   0x2   :  { %s15_s13 = sshll.u32 %s626_s12, 4  ;;  %p579_p0 = scmp.ne.s32.totalorder %s946_s0, %s578_s16  ;;  %s16_s13 = int_to_ptr.vmem [resolvable:$true] %s15_s13 }
   0x3   :  { %p582_p1 = scmp.lt.u32.totalorder %s578_s16, %s946_s0 }
   0x5   :  { %p584_p2 = pnand %p582_p1, %p579_p0 }
   0x7   :  { %587 = shalt.err (!%p584_p2)
}
   0x8   :  { %s588_s21 = scalar_lea.vmem %s16_s13, 16384  ;;  %p593_p4 = scmp.lt.s32.totalorder %s16_s13, %s16_s13 }
   0x9   :  { %p589_p3 = scmp.ne.s32.totalorder %s16_s13, %s588_s21  ;;  %p594_p5 = scmp.lt.s32.totalorder %s588_s21, %s588_s21 }
   0xb   :  { %p595_p6 = por %p594_p5, %p593_p4 }
   0xd   :  { %p596_p7 = pnand %p595_p6, %p589_p3 }
   0xf   :  { %599 = shalt.err (!%p596_p7)
}
  0x10   :  { %s627_s22 = smov 128   ;;  %s628_s23 = smov 8  }
  0x11   :  { %21 = dma.hbm_to_vmem [thread:$0]  %s946_s0, 16384, %s16_s13, [#allocation3], %s627_s22, %s627_s22, %s628_s23  }
  0x12   :  { %622 = dma.done.wait [#allocation3], 16384  }
  0x13   :  { %623 = vsyncadd [#allocation3], 4294950912  ;;  %v29_v0 = vld [vmem:[#allocation2] sm:$0xff]  ;;  %v30_v4 = vld [vmem:[#allocation2 + $0x8] sm:$0xff]  ;;  %s629_s0 = smov [#allocation5]  }
  0x14   :  { %v668_v1 = vld [vmem:[%s947_s1] ss:$0 sm:$0xff]  ;;  %v31_v5 = vld [vmem:[#allocation2 + $0x10] sm:$0xff]  ;;  %v32_v6 = vld [vmem:[#allocation2 + $0x18] sm:$0xff]  ;;  %s560_s1 = sshll.u32 %s629_s0, 4  ;;  %s561_s1 = int_to_ptr.vmem [resolvable:$true] %s560_s1 }
  0x15   :  { %v673_v2 = vld [vmem:[%s948_s2] ss:$0 sm:$0xff]  ;;  %v164_v3 = vsub.f32 %v29_v0, %v668_v1  ;;  %v165_v7 = vsub.f32 %v30_v4, %v668_v1  ;;  %v166_v8 = vsub.f32 %v31_v5, %v668_v1  ;;  %v167_v9 = vsub.f32 %v32_v6, %v668_v1  ;;  %v34_v11 = vld [vmem:[#allocation2 + $0x28] sm:$0xff]  ;;  %v35_v12 = vld [vmem:[#allocation2 + $0x30] sm:$0xff]  ;;  %s600_s2 = scalar_lea.vmem %s561_s1, 16384  ;;  %p605_p9 = scmp.lt.s32.totalorder %s561_s1, %s561_s1 }
  0x16   :  { %v33_v10 = vld [vmem:[#allocation2 + $0x20] sm:$0xff]  ;;  %v169_v15 = vsub.f32 %v34_v11, %v668_v1  ;;  %v170_v16 = vsub.f32 %v35_v12, %v668_v1  ;;  %v36_v17 = vld [vmem:[#allocation2 + $0x38] sm:$0xff]  ;;  %v38_v19 = vld [vmem:[#allocation2 + $0x48] sm:$0xff]  ;;  %p601_p8 = scmp.ne.s32.totalorder %s561_s1, %s600_s2  ;;  %p606_p10 = scmp.lt.s32.totalorder %s600_s2, %s600_s2 }
  0x17   :  { %v299_v13 = vmul.f32 %v673_v2, %v164_v3  ;;  %v168_v14 = vsub.f32 %v33_v10, %v668_v1  ;;  %v37_v18 = vld [vmem:[#allocation2 + $0x40] sm:$0xff]  ;;  %v300_v20 = vmul.f32 %v673_v2, %v165_v7  ;;  %v301_v21 = vmul.f32 %v673_v2, %v166_v8  ;;  %v39_v24 = vld [vmem:[#allocation2 + $0x50] sm:$0xff]  ;;  %v40_v25 = vld [vmem:[#allocation2 + $0x58] sm:$0xff] }
  0x18   :  { %v302_v22 = vmul.f32 %v673_v2, %v167_v9  ;;  %v171_v23 = vsub.f32 %v36_v17, %v668_v1  ;;  %v41_v26 = vld [vmem:[#allocation2 + $0x60] sm:$0xff]  ;;  %v304_v28 = vmul.f32 %v673_v2, %v169_v15  ;;  %v305_v29 = vmul.f32 %v673_v2, %v170_v16  ;;  %v42_v31 = vld [vmem:[#allocation2 + $0x68] sm:$0xff]  ;;  %v43_v32 = vld [vmem:[#allocation2 + $0x70] sm:$0xff]  ;;  %p607_p11 = por %p606_p10, %p605_p9 }
  0x19   :  { %427 = vst [vmem:[#allocation5] sm:$0xff] %v299_v13  ;;  %v303_v27 = vmul.f32 %v673_v2, %v168_v14  ;;  %v172_v30 = vsub.f32 %v37_v18, %v668_v1  ;;  %v44_v33 = vld [vmem:[#allocation2 + $0x78] sm:$0xff]  ;;  %428 = vst [vmem:[#allocation5 + $0x8] sm:$0xff] %v300_v20  ;;  %v173_v35 = vsub.f32 %v38_v19, %v668_v1  ;;  %v45_v38 = vld [vmem:[#allocation2 + $0x80] sm:$0xff] }
  0x1a   :  { %429 = vst [vmem:[#allocation5 + $0x10] sm:$0xff] %v301_v21  ;;  %430 = vst [vmem:[#allocation5 + $0x18] sm:$0xff] %v302_v22  ;;  %v306_v34 = vmul.f32 %v673_v2, %v171_v23  ;;  %v174_v36 = vsub.f32 %v39_v24, %v668_v1  ;;  %v175_v37 = vsub.f32 %v40_v25, %v668_v1  ;;  %v46_v43 = vld [vmem:[#allocation2 + $0x88] sm:$0xff]  ;;  %v47_v44 = vld [vmem:[#allocation2 + $0x90] sm:$0xff]  ;;  %p608_p12 = pnand %p607_p11, %p601_p8 }
  0x1b   :  { %431 = vst [vmem:[#allocation5 + $0x20] sm:$0xff] %v303_v27  ;;  %432 = vst [vmem:[#allocation5 + $0x28] sm:$0xff] %v304_v28  ;;  %v307_v39 = vmul.f32 %v673_v2, %v172_v30  ;;  %v176_v40 = vsub.f32 %v41_v26, %v668_v1  ;;  %v177_v41 = vsub.f32 %v42_v31, %v668_v1  ;;  %v48_v45 = vld [vmem:[#allocation2 + $0x98] sm:$0xff]  ;;  %v49_v50 = vld [vmem:[#allocation2 + $0xa0] sm:$0xff] }
  0x1c   :  { %433 = vst [vmem:[#allocation5 + $0x30] sm:$0xff] %v305_v29  ;;  %v178_v42 = vsub.f32 %v43_v32, %v668_v1  ;;  %434 = vst [vmem:[#allocation5 + $0x38] sm:$0xff] %v306_v34  ;;  %v308_v46 = vmul.f32 %v673_v2, %v173_v35  ;;  %v309_v47 = vmul.f32 %v673_v2, %v174_v36  ;;  %v50_v51 = vld [vmem:[#allocation2 + $0xa8] sm:$0xff]  ;;  %v51_v52 = vld [vmem:[#allocation2 + $0xb0] sm:$0xff] }
  0x1d   :  { %v310_v48 = vmul.f32 %v673_v2, %v175_v37  ;;  %v179_v49 = vsub.f32 %v44_v33, %v668_v1  ;;  %435 = vst [vmem:[#allocation5 + $0x40] sm:$0xff] %v307_v39  ;;  %v311_v53 = vmul.f32 %v673_v2, %v176_v40  ;;  %v312_v54 = vmul.f32 %v673_v2, %v177_v41  ;;  %v52_v57 = vld [vmem:[#allocation2 + $0xb8] sm:$0xff]  ;;  %v53_v62 = vld [vmem:[#allocation2 + $0xc0] sm:$0xff]  ;;  %v54_v5 = vld [vmem:[#allocation2 + $0xc8] sm:$0xff] }
  0x1e   :  { %v313_v55 = vmul.f32 %v673_v2, %v178_v42  ;;  %v180_v56 = vsub.f32 %v45_v38, %v668_v1  ;;  %436 = vst [vmem:[#allocation5 + $0x48] sm:$0xff] %v308_v46  ;;  %437 = vst [vmem:[#allocation5 + $0x50] sm:$0xff] %v309_v47  ;;  %v181_v59 = vsub.f32 %v46_v43, %v668_v1  ;;  %v55_v6 = vld [vmem:[#allocation2 + $0xd0] sm:$0xff]  ;;  %v56_v7 = vld [vmem:[#allocation2 + $0xd8] sm:$0xff] }
  0x1f   :  { %438 = vst [vmem:[#allocation5 + $0x58] sm:$0xff] %v310_v48  ;;  %v314_v58 = vmul.f32 %v673_v2, %v179_v49  ;;  %v182_v60 = vsub.f32 %v47_v44, %v668_v1  ;;  %v183_v61 = vsub.f32 %v48_v45, %v668_v1  ;;  %439 = vst [vmem:[#allocation5 + $0x60] sm:$0xff] %v311_v53  ;;  %v57_v12 = vld [vmem:[#allocation2 + $0xe0] sm:$0xff]  ;;  %v58_v13 = vld [vmem:[#allocation2 + $0xe8] sm:$0xff] }
  0x20   :  { %440 = vst [vmem:[#allocation5 + $0x68] sm:$0xff] %v312_v54  ;;  %441 = vst [vmem:[#allocation5 + $0x70] sm:$0xff] %v313_v55  ;;  %v315_v63 = vmul.f32 %v673_v2, %v180_v56  ;;  %v184_v0 = vsub.f32 %v49_v50, %v668_v1  ;;  %v185_v3 = vsub.f32 %v50_v51, %v668_v1  ;;  %v59_v14 = vld [vmem:[#allocation2 + $0xf0] sm:$0xff]  ;;  %v60_v19 = vld [vmem:[#allocation2 + $0xf8] sm:$0xff] }
  0x21   :  { %v186_v4 = vsub.f32 %v51_v52, %v668_v1  ;;  %442 = vst [vmem:[#allocation5 + $0x78] sm:$0xff] %v314_v58  ;;  %v316_v8 = vmul.f32 %v673_v2, %v181_v59  ;;  %v317_v9 = vmul.f32 %v673_v2, %v182_v60  ;;  %v318_v10 = vmul.f32 %v673_v2, %v183_v61  ;;  %v61_v24 = vld [vmem:[#allocation2 + $0x100] sm:$0xff]  ;;  %v62_v29 = vld [vmem:[#allocation2 + $0x108] sm:$0xff]  ;;  %v63_v30 = vld [vmem:[#allocation2 + $0x110] sm:$0xff] }
  0x22   :  { %v187_v11 = vsub.f32 %v52_v57, %v668_v1  ;;  %443 = vst [vmem:[#allocation5 + $0x80] sm:$0xff] %v315_v63  ;;  %v319_v15 = vmul.f32 %v673_v2, %v184_v0  ;;  %v320_v16 = vmul.f32 %v673_v2, %v185_v3  ;;  %v188_v18 = vsub.f32 %v53_v62, %v668_v1  ;;  %v64_v31 = vld [vmem:[#allocation2 + $0x118] sm:$0xff]  ;;  %v65_v36 = vld [vmem:[#allocation2 + $0x120] sm:$0xff]  ;;  %v66_v37 = vld [vmem:[#allocation2 + $0x128] sm:$0xff] }
  0x23   :  { %v321_v17 = vmul.f32 %v673_v2, %v186_v4  ;;  %444 = vst [vmem:[#allocation5 + $0x88] sm:$0xff] %v316_v8  ;;  %445 = vst [vmem:[#allocation5 + $0x90] sm:$0xff] %v317_v9  ;;  %v189_v21 = vsub.f32 %v54_v5, %v668_v1  ;;  %v190_v22 = vsub.f32 %v55_v6, %v668_v1  ;;  %v67_v38 = vld [vmem:[#allocation2 + $0x130] sm:$0xff]  ;;  %v68_v43 = vld [vmem:[#allocation2 + $0x138] sm:$0xff] }
  0x24   :  { %446 = vst [vmem:[#allocation5 + $0x98] sm:$0xff] %v318_v10  ;;  %v322_v20 = vmul.f32 %v673_v2, %v187_v11  ;;  %v191_v23 = vsub.f32 %v56_v7, %v668_v1  ;;  %447 = vst [vmem:[#allocation5 + $0xa0] sm:$0xff] %v319_v15  ;;  %v323_v25 = vmul.f32 %v673_v2, %v188_v18  ;;  %v69_v48 = vld [vmem:[#allocation2 + $0x140] sm:$0xff]  ;;  %v70_v53 = vld [vmem:[#allocation2 + $0x148] sm:$0xff] }
  0x25   :  { %448 = vst [vmem:[#allocation5 + $0xa8] sm:$0xff] %v320_v16  ;;  %449 = vst [vmem:[#allocation5 + $0xb0] sm:$0xff] %v321_v17  ;;  %v192_v26 = vsub.f32 %v57_v12, %v668_v1  ;;  %v193_v27 = vsub.f32 %v58_v13, %v668_v1  ;;  %v194_v28 = vsub.f32 %v59_v14, %v668_v1  ;;  %v71_v54 = vld [vmem:[#allocation2 + $0x150] sm:$0xff]  ;;  %v72_v55 = vld [vmem:[#allocation2 + $0x158] sm:$0xff] }
  0x26   :  { %450 = vst [vmem:[#allocation5 + $0xb8] sm:$0xff] %v322_v20  ;;  %v324_v32 = vmul.f32 %v673_v2, %v189_v21  ;;  %v325_v33 = vmul.f32 %v673_v2, %v190_v22  ;;  %v326_v34 = vmul.f32 %v673_v2, %v191_v23  ;;  %v195_v35 = vsub.f32 %v60_v19, %v668_v1  ;;  %v73_v60 = vld [vmem:[#allocation2 + $0x160] sm:$0xff]  ;;  %v74_v61 = vld [vmem:[#allocation2 + $0x168] sm:$0xff]  ;;  %v75_v62 = vld [vmem:[#allocation2 + $0x170] sm:$0xff] }
  0x27   :  { %451 = vst [vmem:[#allocation5 + $0xc0] sm:$0xff] %v323_v25  ;;  %v327_v39 = vmul.f32 %v673_v2, %v192_v26  ;;  %v328_v40 = vmul.f32 %v673_v2, %v193_v27  ;;  %v329_v41 = vmul.f32 %v673_v2, %v194_v28  ;;  %v196_v42 = vsub.f32 %v61_v24, %v668_v1  ;;  %v76_v5 = vld [vmem:[#allocation2 + $0x178] sm:$0xff]  ;;  %v77_v10 = vld [vmem:[#allocation2 + $0x180] sm:$0xff]  ;;  %v78_v15 = vld [vmem:[#allocation2 + $0x188] sm:$0xff] }
  0x28   :  { %452 = vst [vmem:[#allocation5 + $0xc8] sm:$0xff] %v324_v32  ;;  %453 = vst [vmem:[#allocation5 + $0xd0] sm:$0xff] %v325_v33  ;;  %v330_v44 = vmul.f32 %v673_v2, %v195_v35  ;;  %v197_v45 = vsub.f32 %v62_v29, %v668_v1  ;;  %v198_v46 = vsub.f32 %v63_v30, %v668_v1  ;;  %v79_v16 = vld [vmem:[#allocation2 + $0x190] sm:$0xff]  ;;  %v80_v17 = vld [vmem:[#allocation2 + $0x198] sm:$0xff] }
  0x29   :  { %454 = vst [vmem:[#allocation5 + $0xd8] sm:$0xff] %v326_v34  ;;  %v199_v47 = vsub.f32 %v64_v31, %v668_v1  ;;  %455 = vst [vmem:[#allocation5 + $0xe0] sm:$0xff] %v327_v39  ;;  %v331_v49 = vmul.f32 %v673_v2, %v196_v42  ;;  %v200_v50 = vsub.f32 %v65_v36, %v668_v1  ;;  %v81_v22 = vld [vmem:[#allocation2 + $0x1a0] sm:$0xff]  ;;  %v82_v23 = vld [vmem:[#allocation2 + $0x1a8] sm:$0xff] }
  0x2a   :  { %456 = vst [vmem:[#allocation5 + $0xe8] sm:$0xff] %v328_v40  ;;  %457 = vst [vmem:[#allocation5 + $0xf0] sm:$0xff] %v329_v41  ;;  %v201_v51 = vsub.f32 %v66_v37, %v668_v1  ;;  %v202_v52 = vsub.f32 %v67_v38, %v668_v1  ;;  %v332_v56 = vmul.f32 %v673_v2, %v197_v45  ;;  %v83_v24 = vld [vmem:[#allocation2 + $0x1b0] sm:$0xff]  ;;  %v84_v29 = vld [vmem:[#allocation2 + $0x1b8] sm:$0xff] }
  0x2b   :  { %458 = vst [vmem:[#allocation5 + $0xf8] sm:$0xff] %v330_v44  ;;  %v333_v57 = vmul.f32 %v673_v2, %v198_v46  ;;  %v334_v58 = vmul.f32 %v673_v2, %v199_v47  ;;  %v203_v59 = vsub.f32 %v68_v43, %v668_v1  ;;  %459 = vst [vmem:[#allocation5 + $0x100] sm:$0xff] %v331_v49  ;;  %v85_v34 = vld [vmem:[#allocation2 + $0x1c0] sm:$0xff]  ;;  %v86_v39 = vld [vmem:[#allocation2 + $0x1c8] sm:$0xff] }
  0x2c   :  { %v335_v63 = vmul.f32 %v673_v2, %v200_v50  ;;  %v336_v0 = vmul.f32 %v673_v2, %v201_v51  ;;  %v337_v3 = vmul.f32 %v673_v2, %v202_v52  ;;  %v204_v4 = vsub.f32 %v69_v48, %v668_v1  ;;  %460 = vst [vmem:[#allocation5 + $0x108] sm:$0xff] %v332_v56  ;;  %v87_v40 = vld [vmem:[#allocation2 + $0x1d0] sm:$0xff]  ;;  %v88_v41 = vld [vmem:[#allocation2 + $0x1d8] sm:$0xff]  ;;  %v89_v46 = vld [vmem:[#allocation2 + $0x1e0] sm:$0xff] }
  0x2d   :  { %461 = vst [vmem:[#allocation5 + $0x110] sm:$0xff] %v333_v57  ;;  %462 = vst [vmem:[#allocation5 + $0x118] sm:$0xff] %v334_v58  ;;  %v338_v6 = vmul.f32 %v673_v2, %v203_v59  ;;  %v205_v7 = vsub.f32 %v70_v53, %v668_v1  ;;  %v206_v8 = vsub.f32 %v71_v54, %v668_v1  ;;  %v90_v47 = vld [vmem:[#allocation2 + $0x1e8] sm:$0xff]  ;;  %v91_v48 = vld [vmem:[#allocation2 + $0x1f0] sm:$0xff] }
  0x2e   :  { %v207_v9 = vsub.f32 %v72_v55, %v668_v1  ;;  %463 = vst [vmem:[#allocation5 + $0x120] sm:$0xff] %v335_v63  ;;  %464 = vst [vmem:[#allocation5 + $0x128] sm:$0xff] %v336_v0  ;;  %v339_v11 = vmul.f32 %v673_v2, %v204_v4  ;;  %v208_v12 = vsub.f32 %v73_v60, %v668_v1  ;;  %v92_v53 = vld [vmem:[#allocation2 + $0x1f8] sm:$0xff]  ;;  %v93_v58 = vld [vmem:[#allocation2 + $0x200] sm:$0xff] }
  0x2f   :  { %465 = vst [vmem:[#allocation5 + $0x130] sm:$0xff] %v337_v3  ;;  %v209_v13 = vsub.f32 %v74_v61, %v668_v1  ;;  %v210_v14 = vsub.f32 %v75_v62, %v668_v1  ;;  %466 = vst [vmem:[#allocation5 + $0x138] sm:$0xff] %v338_v6  ;;  %v340_v18 = vmul.f32 %v673_v2, %v205_v7  ;;  %v94_v63 = vld [vmem:[#allocation2 + $0x208] sm:$0xff]  ;;  %v95_v0 = vld [vmem:[#allocation2 + $0x210] sm:$0xff] }
  0x30   :  { %v341_v19 = vmul.f32 %v673_v2, %v206_v8  ;;  %v342_v20 = vmul.f32 %v673_v2, %v207_v9  ;;  %v211_v21 = vsub.f32 %v76_v5, %v668_v1  ;;  %467 = vst [vmem:[#allocation5 + $0x140] sm:$0xff] %v339_v11  ;;  %v343_v25 = vmul.f32 %v673_v2, %v208_v12  ;;  %v96_v3 = vld [vmem:[#allocation2 + $0x218] sm:$0xff]  ;;  %v97_v8 = vld [vmem:[#allocation2 + $0x220] sm:$0xff]  ;;  %v98_v9 = vld [vmem:[#allocation2 + $0x228] sm:$0xff] }
  0x31   :  { %v344_v26 = vmul.f32 %v673_v2, %v209_v13  ;;  %v345_v27 = vmul.f32 %v673_v2, %v210_v14  ;;  %v212_v28 = vsub.f32 %v77_v10, %v668_v1  ;;  %468 = vst [vmem:[#allocation5 + $0x148] sm:$0xff] %v340_v18  ;;  %v213_v31 = vsub.f32 %v78_v15, %v668_v1  ;;  %v99_v10 = vld [vmem:[#allocation2 + $0x230] sm:$0xff]  ;;  %v100_v15 = vld [vmem:[#allocation2 + $0x238] sm:$0xff] }
  0x32   :  { %469 = vst [vmem:[#allocation5 + $0x150] sm:$0xff] %v341_v19  ;;  %470 = vst [vmem:[#allocation5 + $0x158] sm:$0xff] %v342_v20  ;;  %v346_v30 = vmul.f32 %v673_v2, %v211_v21  ;;  %v214_v32 = vsub.f32 %v79_v16, %v668_v1  ;;  %v215_v33 = vsub.f32 %v80_v17, %v668_v1  ;;  %v101_v20 = vld [vmem:[#allocation2 + $0x240] sm:$0xff] }
  0x33   :  { %471 = vst [vmem:[#allocation5 + $0x160] sm:$0xff] %v343_v25  ;;  %472 = vst [vmem:[#allocation5 + $0x168] sm:$0xff] %v344_v26  ;;  %v347_v35 = vmul.f32 %v673_v2, %v212_v28  ;;  %v216_v36 = vsub.f32 %v81_v22, %v668_v1  ;;  %v217_v37 = vsub.f32 %v82_v23, %v668_v1  ;;  %v102_v25 = vld [vmem:[#allocation2 + $0x248] sm:$0xff]  ;;  %v103_v26 = vld [vmem:[#allocation2 + $0x250] sm:$0xff] }
  0x34   :  { %473 = vst [vmem:[#allocation5 + $0x170] sm:$0xff] %v345_v27  ;;  %v218_v38 = vsub.f32 %v83_v24, %v668_v1  ;;  %474 = vst [vmem:[#allocation5 + $0x178] sm:$0xff] %v346_v30  ;;  %v348_v42 = vmul.f32 %v673_v2, %v213_v31  ;;  %v349_v43 = vmul.f32 %v673_v2, %v214_v32  ;;  %v104_v27 = vld [vmem:[#allocation2 + $0x258] sm:$0xff]  ;;  %v105_v32 = vld [vmem:[#allocation2 + $0x260] sm:$0xff] }
  0x35   :  { %v350_v44 = vmul.f32 %v673_v2, %v215_v33  ;;  %v219_v45 = vsub.f32 %v84_v29, %v668_v1  ;;  %475 = vst [vmem:[#allocation5 + $0x180] sm:$0xff] %v347_v35  ;;  %v351_v49 = vmul.f32 %v673_v2, %v216_v36  ;;  %v352_v50 = vmul.f32 %v673_v2, %v217_v37  ;;  %v106_v33 = vld [vmem:[#allocation2 + $0x268] sm:$0xff] }
  0x36   :  { %v353_v51 = vmul.f32 %v673_v2, %v218_v38  ;;  %v220_v52 = vsub.f32 %v85_v34, %v668_v1  ;;  %476 = vst [vmem:[#allocation5 + $0x188] sm:$0xff] %v348_v42  ;;  %477 = vst [vmem:[#allocation5 + $0x190] sm:$0xff] %v349_v43  ;;  %v221_v55 = vsub.f32 %v86_v39, %v668_v1  ;;  %v107_v34 = vld [vmem:[#allocation2 + $0x270] sm:$0xff]  ;;  %v108_v39 = vld [vmem:[#allocation2 + $0x278] sm:$0xff] }
  0x37   :  { %478 = vst [vmem:[#allocation5 + $0x198] sm:$0xff] %v350_v44  ;;  %v354_v54 = vmul.f32 %v673_v2, %v219_v45  ;;  %v222_v56 = vsub.f32 %v87_v40, %v668_v1  ;;  %v223_v57 = vsub.f32 %v88_v41, %v668_v1  ;;  %479 = vst [vmem:[#allocation5 + $0x1a0] sm:$0xff] %v351_v49  ;;  %v109_v44 = vld [vmem:[#allocation2 + $0x280] sm:$0xff]  ;;  %v110_v49 = vld [vmem:[#allocation2 + $0x288] sm:$0xff] }
  0x38   :  { %480 = vst [vmem:[#allocation5 + $0x1a8] sm:$0xff] %v352_v50  ;;  %481 = vst [vmem:[#allocation5 + $0x1b0] sm:$0xff] %v353_v51  ;;  %v355_v59 = vmul.f32 %v673_v2, %v220_v52  ;;  %v224_v60 = vsub.f32 %v89_v46, %v668_v1  ;;  %v225_v61 = vsub.f32 %v90_v47, %v668_v1  ;;  %v111_v50 = vld [vmem:[#allocation2 + $0x290] sm:$0xff]  ;;  %v112_v51 = vld [vmem:[#allocation2 + $0x298] sm:$0xff] }
  0x39   :  { %v226_v62 = vsub.f32 %v91_v48, %v668_v1  ;;  %482 = vst [vmem:[#allocation5 + $0x1b8] sm:$0xff] %v354_v54  ;;  %v356_v4 = vmul.f32 %v673_v2, %v221_v55  ;;  %v357_v5 = vmul.f32 %v673_v2, %v222_v56  ;;  %v358_v6 = vmul.f32 %v673_v2, %v223_v57  ;;  %v113_v56 = vld [vmem:[#allocation2 + $0x2a0] sm:$0xff]  ;;  %v114_v57 = vld [vmem:[#allocation2 + $0x2a8] sm:$0xff] }
  0x3a   :  { %v227_v7 = vsub.f32 %v92_v53, %v668_v1  ;;  %483 = vst [vmem:[#allocation5 + $0x1c0] sm:$0xff] %v355_v59  ;;  %v359_v11 = vmul.f32 %v673_v2, %v224_v60  ;;  %v360_v12 = vmul.f32 %v673_v2, %v225_v61  ;;  %v228_v14 = vsub.f32 %v93_v58, %v668_v1  ;;  %v115_v58 = vld [vmem:[#allocation2 + $0x2b0] sm:$0xff] }
  0x3b   :  { %v361_v13 = vmul.f32 %v673_v2, %v226_v62  ;;  %484 = vst [vmem:[#allocation5 + $0x1c8] sm:$0xff] %v356_v4  ;;  %485 = vst [vmem:[#allocation5 + $0x1d0] sm:$0xff] %v357_v5  ;;  %v229_v17 = vsub.f32 %v94_v63, %v668_v1  ;;  %v230_v18 = vsub.f32 %v95_v0, %v668_v1  ;;  %v116_v63 = vld [vmem:[#allocation2 + $0x2b8] sm:$0xff] }
  0x3c   :  { %486 = vst [vmem:[#allocation5 + $0x1d8] sm:$0xff] %v358_v6  ;;  %v362_v16 = vmul.f32 %v673_v2, %v227_v7  ;;  %v231_v19 = vsub.f32 %v96_v3, %v668_v1  ;;  %487 = vst [vmem:[#allocation5 + $0x1e0] sm:$0xff] %v359_v11  ;;  %v363_v21 = vmul.f32 %v673_v2, %v228_v14  ;;  %v117_v6 = vld [vmem:[#allocation2 + $0x2c0] sm:$0xff]  ;;  %v118_v11 = vld [vmem:[#allocation2 + $0x2c8] sm:$0xff] }
  0x3d   :  { %488 = vst [vmem:[#allocation5 + $0x1e8] sm:$0xff] %v360_v12  ;;  %489 = vst [vmem:[#allocation5 + $0x1f0] sm:$0xff] %v361_v13  ;;  %v232_v22 = vsub.f32 %v97_v8, %v668_v1  ;;  %v233_v23 = vsub.f32 %v98_v9, %v668_v1  ;;  %v234_v24 = vsub.f32 %v99_v10, %v668_v1  ;;  %v119_v12 = vld [vmem:[#allocation2 + $0x2d0] sm:$0xff]  ;;  %v120_v13 = vld [vmem:[#allocation2 + $0x2d8] sm:$0xff] }
  0x3e   :  { %490 = vst [vmem:[#allocation5 + $0x1f8] sm:$0xff] %v362_v16  ;;  %v364_v28 = vmul.f32 %v673_v2, %v229_v17  ;;  %v365_v29 = vmul.f32 %v673_v2, %v230_v18  ;;  %v366_v30 = vmul.f32 %v673_v2, %v231_v19  ;;  %v235_v31 = vsub.f32 %v100_v15, %v668_v1  ;;  %v121_v18 = vld [vmem:[#allocation2 + $0x2e0] sm:$0xff]  ;;  %v122_v19 = vld [vmem:[#allocation2 + $0x2e8] sm:$0xff] }
  0x3f   :  { %491 = vst [vmem:[#allocation5 + $0x200] sm:$0xff] %v363_v21  ;;  %v367_v35 = vmul.f32 %v673_v2, %v232_v22  ;;  %v368_v36 = vmul.f32 %v673_v2, %v233_v23  ;;  %v369_v37 = vmul.f32 %v673_v2, %v234_v24  ;;  %v236_v38 = vsub.f32 %v101_v20, %v668_v1  ;;  %v123_v20 = vld [vmem:[#allocation2 + $0x2f0] sm:$0xff] }
  0x40   :  { %492 = vst [vmem:[#allocation5 + $0x208] sm:$0xff] %v364_v28  ;;  %493 = vst [vmem:[#allocation5 + $0x210] sm:$0xff] %v365_v29  ;;  %v370_v40 = vmul.f32 %v673_v2, %v235_v31  ;;  %v237_v41 = vsub.f32 %v102_v25, %v668_v1  ;;  %v238_v42 = vsub.f32 %v103_v26, %v668_v1  ;;  %v124_v25 = vld [vmem:[#allocation2 + $0x2f8] sm:$0xff] }
  0x41   :  { %494 = vst [vmem:[#allocation5 + $0x218] sm:$0xff] %v366_v30  ;;  %v239_v43 = vsub.f32 %v104_v27, %v668_v1  ;;  %495 = vst [vmem:[#allocation5 + $0x220] sm:$0xff] %v367_v35  ;;  %v371_v45 = vmul.f32 %v673_v2, %v236_v38  ;;  %v240_v46 = vsub.f32 %v105_v32, %v668_v1  ;;  %v125_v30 = vld [vmem:[#allocation2 + $0x300] sm:$0xff]  ;;  %v126_v35 = vld [vmem:[#allocation2 + $0x308] sm:$0xff] }
  0x42   :  { %496 = vst [vmem:[#allocation5 + $0x228] sm:$0xff] %v368_v36  ;;  %497 = vst [vmem:[#allocation5 + $0x230] sm:$0xff] %v369_v37  ;;  %v241_v47 = vsub.f32 %v106_v33, %v668_v1  ;;  %v242_v48 = vsub.f32 %v107_v34, %v668_v1  ;;  %v372_v52 = vmul.f32 %v673_v2, %v237_v41  ;;  %v127_v36 = vld [vmem:[#allocation2 + $0x310] sm:$0xff]  ;;  %v128_v37 = vld [vmem:[#allocation2 + $0x318] sm:$0xff] }
  0x43   :  { %498 = vst [vmem:[#allocation5 + $0x238] sm:$0xff] %v370_v40  ;;  %v373_v53 = vmul.f32 %v673_v2, %v238_v42  ;;  %v374_v54 = vmul.f32 %v673_v2, %v239_v43  ;;  %v243_v55 = vsub.f32 %v108_v39, %v668_v1  ;;  %499 = vst [vmem:[#allocation5 + $0x240] sm:$0xff] %v371_v45  ;;  %v129_v42 = vld [vmem:[#allocation2 + $0x320] sm:$0xff]  ;;  %v130_v43 = vld [vmem:[#allocation2 + $0x328] sm:$0xff] }
  0x44   :  { %v375_v59 = vmul.f32 %v673_v2, %v240_v46  ;;  %v376_v60 = vmul.f32 %v673_v2, %v241_v47  ;;  %v377_v61 = vmul.f32 %v673_v2, %v242_v48  ;;  %v244_v62 = vsub.f32 %v109_v44, %v668_v1  ;;  %500 = vst [vmem:[#allocation5 + $0x248] sm:$0xff] %v372_v52  ;;  %v131_v44 = vld [vmem:[#allocation2 + $0x330] sm:$0xff] }
  0x45   :  { %501 = vst [vmem:[#allocation5 + $0x250] sm:$0xff] %v373_v53  ;;  %502 = vst [vmem:[#allocation5 + $0x258] sm:$0xff] %v374_v54  ;;  %v378_v0 = vmul.f32 %v673_v2, %v243_v55  ;;  %v245_v3 = vsub.f32 %v110_v49, %v668_v1  ;;  %v246_v4 = vsub.f32 %v111_v50, %v668_v1  ;;  %v132_v49 = vld [vmem:[#allocation2 + $0x338] sm:$0xff]  ;;  %v133_v54 = vld [vmem:[#allocation2 + $0x340] sm:$0xff] }
  0x46   :  { %v247_v5 = vsub.f32 %v112_v51, %v668_v1  ;;  %503 = vst [vmem:[#allocation5 + $0x260] sm:$0xff] %v375_v59  ;;  %504 = vst [vmem:[#allocation5 + $0x268] sm:$0xff] %v376_v60  ;;  %v379_v7 = vmul.f32 %v673_v2, %v244_v62  ;;  %v248_v8 = vsub.f32 %v113_v56, %v668_v1  ;;  %v134_v59 = vld [vmem:[#allocation2 + $0x348] sm:$0xff]  ;;  %v135_v60 = vld [vmem:[#allocation2 + $0x350] sm:$0xff] }
  0x47   :  { %505 = vst [vmem:[#allocation5 + $0x270] sm:$0xff] %v377_v61  ;;  %v249_v9 = vsub.f32 %v114_v57, %v668_v1  ;;  %v250_v10 = vsub.f32 %v115_v58, %v668_v1  ;;  %506 = vst [vmem:[#allocation5 + $0x278] sm:$0xff] %v378_v0  ;;  %v380_v14 = vmul.f32 %v673_v2, %v245_v3  ;;  %v136_v61 = vld [vmem:[#allocation2 + $0x358] sm:$0xff] }
  0x48   :  { %v381_v15 = vmul.f32 %v673_v2, %v246_v4  ;;  %v382_v16 = vmul.f32 %v673_v2, %v247_v5  ;;  %v251_v17 = vsub.f32 %v116_v63, %v668_v1  ;;  %507 = vst [vmem:[#allocation5 + $0x280] sm:$0xff] %v379_v7  ;;  %v383_v21 = vmul.f32 %v673_v2, %v248_v8  ;;  %v137_v4 = vld [vmem:[#allocation2 + $0x360] sm:$0xff]  ;;  %v138_v5 = vld [vmem:[#allocation2 + $0x368] sm:$0xff] }
  0x49   :  { %v384_v22 = vmul.f32 %v673_v2, %v249_v9  ;;  %v385_v23 = vmul.f32 %v673_v2, %v250_v10  ;;  %v252_v24 = vsub.f32 %v117_v6, %v668_v1  ;;  %508 = vst [vmem:[#allocation5 + $0x288] sm:$0xff] %v380_v14  ;;  %v253_v27 = vsub.f32 %v118_v11, %v668_v1  ;;  %v139_v6 = vld [vmem:[#allocation2 + $0x370] sm:$0xff]  ;;  %v140_v11 = vld [vmem:[#allocation2 + $0x378] sm:$0xff] }
  0x4a   :  { %509 = vst [vmem:[#allocation5 + $0x290] sm:$0xff] %v381_v15  ;;  %510 = vst [vmem:[#allocation5 + $0x298] sm:$0xff] %v382_v16  ;;  %v386_v26 = vmul.f32 %v673_v2, %v251_v17  ;;  %v254_v28 = vsub.f32 %v119_v12, %v668_v1  ;;  %v255_v29 = vsub.f32 %v120_v13, %v668_v1  ;;  %v141_v16 = vld [vmem:[#allocation2 + $0x380] sm:$0xff] }
  0x4b   :  { %511 = vst [vmem:[#allocation5 + $0x2a0] sm:$0xff] %v383_v21  ;;  %512 = vst [vmem:[#allocation5 + $0x2a8] sm:$0xff] %v384_v22  ;;  %v387_v31 = vmul.f32 %v673_v2, %v252_v24  ;;  %v256_v32 = vsub.f32 %v121_v18, %v668_v1  ;;  %v257_v33 = vsub.f32 %v122_v19, %v668_v1  ;;  %v142_v21 = vld [vmem:[#allocation2 + $0x388] sm:$0xff]  ;;  %v143_v22 = vld [vmem:[#allocation2 + $0x390] sm:$0xff] }
  0x4c   :  { %513 = vst [vmem:[#allocation5 + $0x2b0] sm:$0xff] %v385_v23  ;;  %v258_v34 = vsub.f32 %v123_v20, %v668_v1  ;;  %514 = vst [vmem:[#allocation5 + $0x2b8] sm:$0xff] %v386_v26  ;;  %v388_v38 = vmul.f32 %v673_v2, %v253_v27  ;;  %v389_v39 = vmul.f32 %v673_v2, %v254_v28  ;;  %v144_v23 = vld [vmem:[#allocation2 + $0x398] sm:$0xff]  ;;  %v145_v28 = vld [vmem:[#allocation2 + $0x3a0] sm:$0xff] }
  0x4d   :  { %v390_v40 = vmul.f32 %v673_v2, %v255_v29  ;;  %v259_v41 = vsub.f32 %v124_v25, %v668_v1  ;;  %515 = vst [vmem:[#allocation5 + $0x2c0] sm:$0xff] %v387_v31  ;;  %v391_v45 = vmul.f32 %v673_v2, %v256_v32  ;;  %v392_v46 = vmul.f32 %v673_v2, %v257_v33  ;;  %v146_v29 = vld [vmem:[#allocation2 + $0x3a8] sm:$0xff] }
  0x4e   :  { %v393_v47 = vmul.f32 %v673_v2, %v258_v34  ;;  %v260_v48 = vsub.f32 %v125_v30, %v668_v1  ;;  %516 = vst [vmem:[#allocation5 + $0x2c8] sm:$0xff] %v388_v38  ;;  %517 = vst [vmem:[#allocation5 + $0x2d0] sm:$0xff] %v389_v39  ;;  %v261_v51 = vsub.f32 %v126_v35, %v668_v1  ;;  %v147_v30 = vld [vmem:[#allocation2 + $0x3b0] sm:$0xff]  ;;  %v148_v35 = vld [vmem:[#allocation2 + $0x3b8] sm:$0xff] }
  0x4f   :  { %518 = vst [vmem:[#allocation5 + $0x2d8] sm:$0xff] %v390_v40  ;;  %v394_v50 = vmul.f32 %v673_v2, %v259_v41  ;;  %v262_v52 = vsub.f32 %v127_v36, %v668_v1  ;;  %v263_v53 = vsub.f32 %v128_v37, %v668_v1  ;;  %519 = vst [vmem:[#allocation5 + $0x2e0] sm:$0xff] %v391_v45  ;;  %v149_v40 = vld [vmem:[#allocation2 + $0x3c0] sm:$0xff]  ;;  %v150_v45 = vld [vmem:[#allocation2 + $0x3c8] sm:$0xff] }
  0x50   :  { %520 = vst [vmem:[#allocation5 + $0x2e8] sm:$0xff] %v392_v46  ;;  %521 = vst [vmem:[#allocation5 + $0x2f0] sm:$0xff] %v393_v47  ;;  %v395_v55 = vmul.f32 %v673_v2, %v260_v48  ;;  %v264_v56 = vsub.f32 %v129_v42, %v668_v1  ;;  %v265_v57 = vsub.f32 %v130_v43, %v668_v1  ;;  %v151_v46 = vld [vmem:[#allocation2 + $0x3d0] sm:$0xff]  ;;  %v152_v47 = vld [vmem:[#allocation2 + $0x3d8] sm:$0xff] }
  0x51   :  { %v266_v58 = vsub.f32 %v131_v44, %v668_v1  ;;  %522 = vst [vmem:[#allocation5 + $0x2f8] sm:$0xff] %v394_v50  ;;  %v396_v62 = vmul.f32 %v673_v2, %v261_v51  ;;  %v397_v63 = vmul.f32 %v673_v2, %v262_v52  ;;  %v398_v0 = vmul.f32 %v673_v2, %v263_v53  ;;  %v153_v52 = vld [vmem:[#allocation2 + $0x3e0] sm:$0xff]  ;;  %v154_v53 = vld [vmem:[#allocation2 + $0x3e8] sm:$0xff] }
  0x52   :  { %v267_v3 = vsub.f32 %v132_v49, %v668_v1  ;;  %523 = vst [vmem:[#allocation5 + $0x300] sm:$0xff] %v395_v55  ;;  %v399_v7 = vmul.f32 %v673_v2, %v264_v56  ;;  %v400_v8 = vmul.f32 %v673_v2, %v265_v57  ;;  %v268_v10 = vsub.f32 %v133_v54, %v668_v1  ;;  %v155_v54 = vld [vmem:[#allocation2 + $0x3f0] sm:$0xff] }
  0x53   :  { %v401_v9 = vmul.f32 %v673_v2, %v266_v58  ;;  %524 = vst [vmem:[#allocation5 + $0x308] sm:$0xff] %v396_v62  ;;  %525 = vst [vmem:[#allocation5 + $0x310] sm:$0xff] %v397_v63  ;;  %v269_v13 = vsub.f32 %v134_v59, %v668_v1  ;;  %v270_v14 = vsub.f32 %v135_v60, %v668_v1  ;;  %v156_v59 = vld [vmem:[#allocation2 + $0x3f8] sm:$0xff] }
  0x54   :  { %526 = vst [vmem:[#allocation5 + $0x318] sm:$0xff] %v398_v0  ;;  %v402_v12 = vmul.f32 %v673_v2, %v267_v3  ;;  %v271_v15 = vsub.f32 %v136_v61, %v668_v1  ;;  %527 = vst [vmem:[#allocation5 + $0x320] sm:$0xff] %v399_v7  ;;  %v403_v17 = vmul.f32 %v673_v2, %v268_v10 }
  0x55   :  { %528 = vst [vmem:[#allocation5 + $0x328] sm:$0xff] %v400_v8  ;;  %529 = vst [vmem:[#allocation5 + $0x330] sm:$0xff] %v401_v9  ;;  %v272_v18 = vsub.f32 %v137_v4, %v668_v1  ;;  %v273_v19 = vsub.f32 %v138_v5, %v668_v1  ;;  %v274_v20 = vsub.f32 %v139_v6, %v668_v1 }
  0x56   :  { %530 = vst [vmem:[#allocation5 + $0x338] sm:$0xff] %v402_v12  ;;  %v404_v24 = vmul.f32 %v673_v2, %v269_v13  ;;  %v405_v25 = vmul.f32 %v673_v2, %v270_v14  ;;  %v406_v26 = vmul.f32 %v673_v2, %v271_v15  ;;  %v275_v27 = vsub.f32 %v140_v11, %v668_v1 }
  0x57   :  { %531 = vst [vmem:[#allocation5 + $0x340] sm:$0xff] %v403_v17  ;;  %v407_v31 = vmul.f32 %v673_v2, %v272_v18  ;;  %v408_v32 = vmul.f32 %v673_v2, %v273_v19  ;;  %v409_v33 = vmul.f32 %v673_v2, %v274_v20  ;;  %v276_v34 = vsub.f32 %v141_v16, %v668_v1 }
  0x58   :  { %532 = vst [vmem:[#allocation5 + $0x348] sm:$0xff] %v404_v24  ;;  %533 = vst [vmem:[#allocation5 + $0x350] sm:$0xff] %v405_v25  ;;  %v410_v36 = vmul.f32 %v673_v2, %v275_v27  ;;  %v277_v37 = vsub.f32 %v142_v21, %v668_v1  ;;  %v278_v38 = vsub.f32 %v143_v22, %v668_v1 }
  0x59   :  { %534 = vst [vmem:[#allocation5 + $0x358] sm:$0xff] %v406_v26  ;;  %v279_v39 = vsub.f32 %v144_v23, %v668_v1  ;;  %535 = vst [vmem:[#allocation5 + $0x360] sm:$0xff] %v407_v31  ;;  %v411_v41 = vmul.f32 %v673_v2, %v276_v34  ;;  %v280_v42 = vsub.f32 %v145_v28, %v668_v1 }
  0x5a   :  { %536 = vst [vmem:[#allocation5 + $0x368] sm:$0xff] %v408_v32  ;;  %537 = vst [vmem:[#allocation5 + $0x370] sm:$0xff] %v409_v33  ;;  %v281_v43 = vsub.f32 %v146_v29, %v668_v1  ;;  %v282_v44 = vsub.f32 %v147_v30, %v668_v1  ;;  %v412_v48 = vmul.f32 %v673_v2, %v277_v37 }
  0x5b   :  { %538 = vst [vmem:[#allocation5 + $0x378] sm:$0xff] %v410_v36  ;;  %v413_v49 = vmul.f32 %v673_v2, %v278_v38  ;;  %v414_v50 = vmul.f32 %v673_v2, %v279_v39  ;;  %v283_v51 = vsub.f32 %v148_v35, %v668_v1  ;;  %539 = vst [vmem:[#allocation5 + $0x380] sm:$0xff] %v411_v41 }
  0x5c   :  { %v415_v55 = vmul.f32 %v673_v2, %v280_v42  ;;  %v416_v56 = vmul.f32 %v673_v2, %v281_v43  ;;  %v417_v57 = vmul.f32 %v673_v2, %v282_v44  ;;  %v284_v58 = vsub.f32 %v149_v40, %v668_v1  ;;  %540 = vst [vmem:[#allocation5 + $0x388] sm:$0xff] %v412_v48 }
  0x5d   :  { %541 = vst [vmem:[#allocation5 + $0x390] sm:$0xff] %v413_v49  ;;  %542 = vst [vmem:[#allocation5 + $0x398] sm:$0xff] %v414_v50  ;;  %v418_v60 = vmul.f32 %v673_v2, %v283_v51  ;;  %v285_v61 = vsub.f32 %v150_v45, %v668_v1  ;;  %v286_v62 = vsub.f32 %v151_v46, %v668_v1 }
  0x5e   :  { %v287_v63 = vsub.f32 %v152_v47, %v668_v1  ;;  %543 = vst [vmem:[#allocation5 + $0x3a0] sm:$0xff] %v415_v55  ;;  %544 = vst [vmem:[#allocation5 + $0x3a8] sm:$0xff] %v416_v56  ;;  %v419_v0 = vmul.f32 %v673_v2, %v284_v58  ;;  %v288_v3 = vsub.f32 %v153_v52, %v668_v1 }
  0x5f   :  { %545 = vst [vmem:[#allocation5 + $0x3b0] sm:$0xff] %v417_v57  ;;  %v289_v4 = vsub.f32 %v154_v53, %v668_v1  ;;  %v290_v5 = vsub.f32 %v155_v54, %v668_v1  ;;  %546 = vst [vmem:[#allocation5 + $0x3b8] sm:$0xff] %v418_v60  ;;  %v420_v6 = vmul.f32 %v673_v2, %v285_v61 }
  0x60   :  { %v421_v7 = vmul.f32 %v673_v2, %v286_v62  ;;  %v422_v8 = vmul.f32 %v673_v2, %v287_v63  ;;  %v291_v9 = vsub.f32 %v156_v59, %v668_v1  ;;  %547 = vst [vmem:[#allocation5 + $0x3c0] sm:$0xff] %v419_v0  ;;  %v423_v10 = vmul.f32 %v673_v2, %v288_v3 }
  0x61   :  { %v424_v11 = vmul.f32 %v673_v2, %v289_v4  ;;  %v425_v12 = vmul.f32 %v673_v2, %v290_v5  ;;  %548 = vst [vmem:[#allocation5 + $0x3c8] sm:$0xff] %v420_v6 }
  0x62   :  { %549 = vst [vmem:[#allocation5 + $0x3d0] sm:$0xff] %v421_v7  ;;  %550 = vst [vmem:[#allocation5 + $0x3d8] sm:$0xff] %v422_v8  ;;  %v426_v13 = vmul.f32 %v673_v2, %v291_v9 }
  0x63   :  { %551 = vst [vmem:[#allocation5 + $0x3e0] sm:$0xff] %v423_v10  ;;  %552 = vst [vmem:[#allocation5 + $0x3e8] sm:$0xff] %v424_v11 }
  0x64   :  { %553 = vst [vmem:[#allocation5 + $0x3f0] sm:$0xff] %v425_v12  ;;  %554 = vst [vmem:[#allocation5 + $0x3f8] sm:$0xff] %v426_v13 }
  0x65   :  { %611 = shalt.err (!%p608_p12)
}
  0x66   :  { %s612_s5 = scalar_lea.hbm %s949_s3, 16384 }
  0x67   :  { %p613_p13 = scmp.ne.s32.totalorder %s949_s3, %s612_s5  ;;  %p616_p0 = scmp.lt.u32.totalorder %s612_s5, %s949_s3 }
  0x69   :  { %p618_p1 = pnand %p616_p0, %p613_p13 }
  0x6b   :  { %621 = shalt.err (!%p618_p1)
}
  0x6c   :  { %566 = dma.vmem_to_hbm [thread:$0]  %s561_s1, 16384, %s949_s3, [#allocation4], %s627_s22, %s627_s22, %s628_s23  }
  0x6d   :  { %624 = dma.done.wait [#allocation4], 16384  }
  0x6e   :  { %625 = vsyncadd [#allocation4], 4294950912 }
  0x6f   :  { %570 = vsyncpa [#allocation3], 1 }
  0x70   :  { %571 = vsyncpa [#allocation4], 1 }

</bundles_post_ra>
